<compile_context>
chip_gen: v7x
topology: tpu7x:2x2x1
jax: 0.10.0
libtpu: 0.0.40
codegen_flags: <defaults>
</compile_context>

<pallas_src>
import jax
import jax.numpy as jnp
import numpy as np
from jax.experimental import pallas as pl
from jax.experimental.pallas import tpu as pltpu


# ----------------------------- Pallas kernel -------------------------------

def manager_critic_kernel(
    x_ref,      # (T*BT, o_dim) time-major within the batch tile: row = t*BT + b
    a_ref,      # (BT, a_dim)
    wihf_ref,   # (o_dim, 4H)   fwd input weights, gates (i,f,o,g), i/f/o * 0.5
    bf_ref,     # (1, 4H)       folded ih+hh fwd biases, same packing/scaling
    whhf_ref,   # (H, 4H)       fwd recurrent weights, same packing/scaling
    wihb_ref,   # (o_dim, 4H)   bwd input weights (last step only)
    bb_ref,     # (1, 4H)       folded bwd biases
    wfc_ref,    # (2H, S)
    bfc_ref,    # (1, S)
    wq1_ref,    # (S+A, 2*h0)   [w1 | w4]
    bq1_ref,    # (1, 2*h0)
    wq2_ref,    # (2*h0, 2*h1)  block-diag(w2, w5)
    bq2_ref,    # (1, 2*h1)
    wq3_ref,    # (2*h1, 2)     block-diag(w3, w6)
    bq3_ref,    # (1, 2)
    q_ref,      # (BT, 2) -> [:, 0] = q1, [:, 1] = q2
):
    BT = a_ref.shape[0]
    T = x_ref.shape[0] // BT
    H = whhf_ref.shape[0]

    x = x_ref[...]
    whh = whhf_ref[...]

    # Forward-direction input projection for ALL timesteps: one MXU matmul.
    pre_f = (jnp.dot(x, wihf_ref[...], preferred_element_type=jnp.float32)
             + bf_ref[...])                                    # (T*BT, 4H)
    # Backward direction is only read at r_out[:, -1, :]: project the
    # last-timestep slab only (h @ W_hh_bwd from a zero state is exactly 0).
    pre_b = (jnp.dot(x[(T - 1) * BT:, :], wihb_ref[...],
                     preferred_element_type=jnp.float32)
             + bb_ref[...])                                    # (BT, 4H)

    def cell(gates, c_prev):
        # gates packed (i, f, o, g) with i/f/o pre-activations scaled by 0.5
        # at pack time, so sigmoid(z) = 0.5*tanh(z/2) + 0.5 and the whole
        # gate block needs a SINGLE tanh (EUP) launch per step.
        t_all = jnp.tanh(gates)
        sig = 0.5 * t_all[:, :3 * H] + 0.5
        i = sig[:, :H]
        f = sig[:, H:2 * H]
        o = sig[:, 2 * H:3 * H]
        g = t_all[:, 3 * H:]
        c = f * c_prev + i * g
        h = o * jnp.tanh(c)
        return h, c

    # ---- forward-direction LSTM recurrence ----
    # t = 0 starts from a zero state, so the h @ W_hh term is exactly zero.
    h, c = cell(pre_f[0:BT, :], jnp.zeros((BT, H), jnp.float32))
    # TODO(synk): if the bundle dump shows the identical (H,4H) RHS being
    # re-staged every iteration, hold whh in MXU weight registers across the
    # serial steps via pltpu.matmul_push_rhs / matmul_acc_lhs / matmul_pop.
    # TODO(synk): switch to lax.fori_loop(..., unroll=True) if T grows well
    # beyond ~8 (static unrolling would then bloat vreg live ranges).
    for t in range(1, T):
        gates = pre_f[t * BT:(t + 1) * BT, :] + jnp.dot(
            h, whh, preferred_element_type=jnp.float32)
        h, c = cell(gates, c)

    # ---- backward direction at the last timestep (zero initial state) ----
    hb, _ = cell(pre_b, jnp.zeros((BT, H), jnp.float32))

    # ---- fc over concatenated bidirectional features: one matmul ----
    feat = jnp.concatenate([h, hb], axis=1)                    # (BT, 2H)
    state = (jnp.dot(feat, wfc_ref[...], preferred_element_type=jnp.float32)
             + bfc_ref[...])                                   # (BT, S)
    sa = jnp.concatenate([state, a_ref[...]], axis=1)          # (BT, S+A)

    # ---- fused twin Q-heads: three matmuls total ----
    z = jnp.maximum(
        jnp.dot(sa, wq1_ref[...], preferred_element_type=jnp.float32)
        + bq1_ref[...], 0.0)
    z = jnp.maximum(
        jnp.dot(z, wq2_ref[...], preferred_element_type=jnp.float32)
        + bq2_ref[...], 0.0)
    q_ref[...] = (jnp.dot(z, wq3_ref[...], preferred_element_type=jnp.float32)
                  + bq3_ref[...])


# ------------------------------- wrapper ------------------------------------

def manager_critic_forward(state, action, packed, *, batch_tile=8):
    """state: (B, T*o_dim) or (B, T, o_dim); action: (B, a_dim)."""
    T, o_dim = packed["T"], packed["o_dim"]
    B, a_dim = action.shape
    BT = max(8, (batch_tile // 8) * 8)          # sublane-aligned batch tile
    n_tiles = pl.cdiv(B, BT)
    BP = n_tiles * BT

    x = jnp.asarray(state, jnp.float32).reshape(B, T, o_dim)
    pad = BP - B
    x = jnp.pad(x, ((0, pad), (0, 0), (0, 0)))
    a = jnp.pad(jnp.asarray(action, jnp.float32), ((0, pad), (0, 0)))
    # Per-tile, time-major layout: (n_tiles, T*BT, o_dim) with row = t*BT + b,
    # so per-timestep slabs inside the kernel are whole sublane tiles and no
    # in-kernel reshape is needed.
    x_tiles = (x.reshape(n_tiles, BT, T, o_dim)
                .transpose(0, 2, 1, 3)
                .reshape(n_tiles, T * BT, o_dim))

    weights = (
        packed["wih_f"], packed["b_f"], packed["whh_f"],
        packed["wih_b"], packed["b_b"],
        packed["wfc"], packed["bfc"],
        packed["wq1"], packed["bq1"],
        packed["wq2"], packed["bq2"],
        packed["wq3"], packed["bq3"],
    )

    def w_spec(arr):
        # constant index map -> weight block stays VMEM-resident across grid.
        return pl.BlockSpec(arr.shape, lambda j: (0, 0))

    # TODO(synk): for production shapes, size BT against v7x's 64 MiB VMEM
    # (not v5e/v6e's 128 MiB) and set vmem_limit_bytes explicitly.
    q = pl.pallas_call(
        manager_critic_kernel,
        out_shape=jax.ShapeDtypeStruct((BP, 2), jnp.float32),
        grid=(n_tiles,),
        in_specs=[
            pl.BlockSpec((pl.Squeezed(), T * BT, o_dim), lambda j: (j, 0, 0)),
            pl.BlockSpec((BT, a_dim), lambda j: (j, 0)),
            *[w_spec(w) for w in weights],
        ],
        out_specs=pl.BlockSpec((BT, 2), lambda j: (j, 0)),
        compiler_params=pltpu.CompilerParams(
            dimension_semantics=("parallel",)),
    )(x_tiles, a, *weights)

    q = q[:B]   # drop padded (garbage) batch rows
    return q[:, 0:1], q[:, 1:2]


# ------------------------ weight packing (layout only) ----------------------

def _permute_gates(w):
    """Column-permute a (..., 4H) gate tensor from (i,f,g,o) to (i,f,o,g)."""
    H = w.shape[-1] // 4
    return jnp.concatenate(
        [w[..., :2 * H], w[..., 3 * H:4 * H], w[..., 2 * H:3 * H]], axis=-1)


def _halve_ifo(w):
    """Scale the i/f/o columns (first 3H of (i,f,o,g) layout) by 0.5 so the
    kernel can compute sigmoid(z) as 0.5*tanh(z/2)+0.5 with one tanh."""
    H = w.shape[-1] // 4
    return jnp.concatenate([0.5 * w[..., :3 * H], w[..., 3 * H:]], axis=-1)


def _pack_gate(w):
    return _halve_ifo(_permute_gates(w))


def pack_params(p):
    h0 = p["w1"].shape[1]
    h1 = p["w2"].shape[1]
    z01 = jnp.zeros((h0, h1), jnp.float32)
    z1 = jnp.zeros((h1, 1), jnp.float32)

    return dict(
        T=p["T"], o_dim=p["o_dim"], s_dim=p["s_dim"], a_dim=p["a_dim"],
        # forward direction: all timesteps; backward: only last-step slab used
        wih_f=_pack_gate(p["wih_f"]),
        whh_f=_pack_gate(p["whh_f"]),
        b_f=_pack_gate(p["b_f"]),
        wih_b=_pack_gate(p["wih_b"]),
        b_b=_pack_gate(p["b_b"]),
        wfc=p["wfc"], bfc=p["bfc"],
        # fused twin heads
        wq1=jnp.concatenate([p["w1"], p["w4"]], axis=1),
        bq1=jnp.concatenate([p["b1"], p["b4"]], axis=1),
        wq2=jnp.concatenate(
            [jnp.concatenate([p["w2"], z01], axis=1),
             jnp.concatenate([z01, p["w5"]], axis=1)], axis=0),
        bq2=jnp.concatenate([p["b2"], p["b5"]], axis=1),
        wq3=jnp.concatenate(
            [jnp.concatenate([p["w3"], z1], axis=1),
             jnp.concatenate([z1, p["w6"]], axis=1)], axis=0),
        bq3=jnp.concatenate([p["b3"], p["b6"]], axis=1),
    )


# -------------------------- deterministic init ------------------------------

def init_params(key, o_dim, s_dim, a_dim, t, hidden_dim):
    H = s_dim
    keys = jax.random.split(key, 9)

    def lin(k, din, dout):
        kw, kb = jax.random.split(k)
        bound = 1.0 / np.sqrt(din)
        W = jax.random.uniform(kw, (din, dout), jnp.float32, -bound, bound)
        b = jax.random.uniform(kb, (1, dout), jnp.float32, -bound, bound)
        return W, b

    def lstm_dir(k):
        k1, k2, k3, k4 = jax.random.split(k, 4)
        bound = 1.0 / np.sqrt(H)
        wih = jax.random.uniform(k1, (o_dim, 4 * H), jnp.float32, -bound, bound)
        whh = jax.random.uniform(k2, (H, 4 * H), jnp.float32, -bound, bound)
        b_ih = jax.random.uniform(k3, (1, 4 * H), jnp.float32, -bound, bound)
        b_hh = jax.random.uniform(k4, (1, 4 * H), jnp.float32, -bound, bound)
        return wih, whh, b_ih + b_hh   # fold the two biases together

    wih_f, whh_f, b_f = lstm_dir(keys[0])
    wih_b, whh_b, b_b = lstm_dir(keys[1])
    wfc, bfc = lin(keys[2], 2 * H, s_dim)
    w1, b1 = lin(keys[3], s_dim + a_dim, hidden_dim[0])
    w2, b2 = lin(keys[4], hidden_dim[0], hidden_dim[1])
    w3, b3 = lin(keys[5], hidden_dim[1], 1)
    w4, b4 = lin(keys[6], s_dim + a_dim, hidden_dim[0])
    w5, b5 = lin(keys[7], hidden_dim[0], hidden_dim[1])
    w6, b6 = lin(keys[8], hidden_dim[1], 1)

    return dict(
        T=t, o_dim=o_dim, s_dim=s_dim, a_dim=a_dim,
        wih_f=wih_f, whh_f=whh_f, b_f=b_f,
        wih_b=wih_b, whh_b=whh_b, b_b=b_b,
        wfc=wfc, bfc=bfc,
        w1=w1, b1=b1, w2=w2, b2=b2, w3=w3, b3=b3,
        w4=w4, b4=b4, w5=w5, b5=b5, w6=w6, b6=b6,
    )


# ---------------------------- pure-JAX reference ----------------------------

def reference_forward(state, action, p):
    """Matches the PyTorch module with PyTorch (i,f,g,o) gate layout."""
    T, o_dim, H = p["T"], p["o_dim"], p["s_dim"]
    x = jnp.asarray(state, jnp.float32).reshape(-1, T, o_dim)
    a = jnp.asarray(action, jnp.float32)
    B = a.shape[0]

    def step(x_t, h, c, wih, whh, b):
        gates = x_t @ wih + h @ whh + b
        i = jax.nn.sigmoid(gates[:, :H])
        f = jax.nn.sigmoid(gates[:, H:2 * H])
        g = jnp.tanh(gates[:, 2 * H:3 * H])
        o = jax.nn.sigmoid(gates[:, 3 * H:])
        c = f * c + i * g
        h = o * jnp.tanh(c)
        return h, c

    h = jnp.zeros((B, H)); c = jnp.zeros((B, H))
    for t in range(T):
        h, c = step(x[:, t, :], h, c, p["wih_f"], p["whh_f"], p["b_f"])
    hb = jnp.zeros((B, H)); cb = jnp.zeros((B, H))
    hb, _ = step(x[:, T - 1, :], hb, cb, p["wih_b"], p["whh_b"], p["b_b"])

    s = jnp.concatenate([h, hb], 1) @ p["wfc"] + p["bfc"]
    sa = jnp.concatenate([s, a], 1)
    x1 = jax.nn.relu(sa @ p["w1"] + p["b1"])
    x1 = jax.nn.relu(x1 @ p["w2"] + p["b2"])
    q1 = x1 @ p["w3"] + p["b3"]
    x2 = jax.nn.relu(sa @ p["w4"] + p["b4"])
    x2 = jax.nn.relu(x2 @ p["w5"] + p["b5"])
    q2 = x2 @ p["w6"] + p["b6"]
    return q1, q2


# ---------------------------------- main -------------------------------------

if __name__ == "__main__":
    # TODO(synk): only the t > 1 branch (with the LSTM encoder) is implemented;
    # the t == 1 branch is the same MLP with s_dim = o_dim and no recurrence.
    B, o_dim, s_dim, a_dim, T = 2, 16, 32, 8, 8
    hidden_dim = (32, 32)

    key = jax.random.PRNGKey(0)
    kp, ks, ka = jax.random.split(key, 3)
    params = init_params(kp, o_dim, s_dim, a_dim, T, hidden_dim)
    packed = pack_params(params)   # layout-only repack, done once

    state = jax.random.normal(ks, (B, T * o_dim), jnp.float32)
    action = jax.random.normal(ka, (B, a_dim), jnp.float32)

    q1, q2 = manager_critic_forward(state, action, packed)
    jax.block_until_ready((q1, q2))

    r1, r2 = reference_forward(state, action, params)
    assert q1.shape == (B, 1) and q2.shape == (B, 1)
    np.testing.assert_allclose(np.asarray(q1), np.asarray(r1), rtol=1e-3, atol=1e-3)
    np.testing.assert_allclose(np.asarray(q2), np.asarray(r2), rtol=1e-3, atol=1e-3)
    print("KERNEL_OK")
</pallas_src>

<mosaic_0001>
module attributes {stable_mosaic.version = 11 : i64} {
  func.func @manager_critic_kernel(%arg0: i32, %arg1: memref<1x64x16xf32, #tpu.memory_space<vmem>>, %arg2: memref<8x8xf32, #tpu.memory_space<vmem>>, %arg3: memref<16x128xf32, #tpu.memory_space<vmem>>, %arg4: memref<1x128xf32, #tpu.memory_space<vmem>>, %arg5: memref<32x128xf32, #tpu.memory_space<vmem>>, %arg6: memref<16x128xf32, #tpu.memory_space<vmem>>, %arg7: memref<1x128xf32, #tpu.memory_space<vmem>>, %arg8: memref<64x32xf32, #tpu.memory_space<vmem>>, %arg9: memref<1x32xf32, #tpu.memory_space<vmem>>, %arg10: memref<40x64xf32, #tpu.memory_space<vmem>>, %arg11: memref<1x64xf32, #tpu.memory_space<vmem>>, %arg12: memref<64x64xf32, #tpu.memory_space<vmem>>, %arg13: memref<1x64xf32, #tpu.memory_space<vmem>>, %arg14: memref<64x2xf32, #tpu.memory_space<vmem>>, %arg15: memref<1x2xf32, #tpu.memory_space<vmem>>, %arg16: memref<8x2xf32, #tpu.memory_space<vmem>>) attributes {dimension_semantics = [#tpu.dimension_semantics<parallel>], iteration_bounds = array<i64: 1>, scalar_prefetch = 0 : i64, scratch_operands = 0 : i64, tpu.core_type = #tpu.core_type<tc>, window_params = [{transform_indices = @transform_0, window_bounds = array<i64: 1, 64, 16>}, {transform_indices = @transform_1, window_bounds = array<i64: 8, 8>}, {pipeline_mode = #tpu.pipeline_mode<synchronous>, transform_indices = @transform_2, window_bounds = array<i64: 16, 128>}, {pipeline_mode = #tpu.pipeline_mode<synchronous>, transform_indices = @transform_3, window_bounds = array<i64: 1, 128>}, {pipeline_mode = #tpu.pipeline_mode<synchronous>, transform_indices = @transform_4, window_bounds = array<i64: 32, 128>}, {pipeline_mode = #tpu.pipeline_mode<synchronous>, transform_indices = @transform_5, window_bounds = array<i64: 16, 128>}, {pipeline_mode = #tpu.pipeline_mode<synchronous>, transform_indices = @transform_6, window_bounds = array<i64: 1, 128>}, {pipeline_mode = #tpu.pipeline_mode<synchronous>, transform_indices = @transform_7, window_bounds = array<i64: 64, 32>}, {pipeline_mode = #tpu.pipeline_mode<synchronous>, transform_indices = @transform_8, window_bounds = array<i64: 1, 32>}, {pipeline_mode = #tpu.pipeline_mode<synchronous>, transform_indices = @transform_9, window_bounds = array<i64: 40, 64>}, {pipeline_mode = #tpu.pipeline_mode<synchronous>, transform_indices = @transform_10, window_bounds = array<i64: 1, 64>}, {pipeline_mode = #tpu.pipeline_mode<synchronous>, transform_indices = @transform_11, window_bounds = array<i64: 64, 64>}, {pipeline_mode = #tpu.pipeline_mode<synchronous>, transform_indices = @transform_12, window_bounds = array<i64: 1, 64>}, {pipeline_mode = #tpu.pipeline_mode<synchronous>, transform_indices = @transform_13, window_bounds = array<i64: 64, 2>}, {pipeline_mode = #tpu.pipeline_mode<synchronous>, transform_indices = @transform_14, window_bounds = array<i64: 1, 2>}, {transform_indices = @transform_15, window_bounds = array<i64: 8, 2>}]} {
    %c0 = arith.constant 0 : index
    %c0_0 = arith.constant 0 : index
    %c0_1 = arith.constant 0 : index
    %0 = vector.load %arg1[%c0, %c0_0, %c0_1] : memref<1x64x16xf32, #tpu.memory_space<vmem>>, vector<1x64x16xf32>
    %1 = vector.shape_cast %0 : vector<1x64x16xf32> to vector<64x16xf32>
    %c0_2 = arith.constant 0 : index
    %c0_3 = arith.constant 0 : index
    %2 = vector.load %arg5[%c0_2, %c0_3] : memref<32x128xf32, #tpu.memory_space<vmem>>, vector<32x128xf32>
    %c0_4 = arith.constant 0 : index
    %c0_5 = arith.constant 0 : index
    %3 = vector.load %arg3[%c0_4, %c0_5] : memref<16x128xf32, #tpu.memory_space<vmem>>, vector<16x128xf32>
    %cst = arith.constant dense<0.000000e+00> : vector<64x128xf32>
    %4 = tpu.matmul %1, %3, %cst {dimension_numbers = #tpu.dot_dimension_numbers<[1], [0], [0], [1], [0, 0, 1, 1], [], []>} : vector<64x16xf32>, vector<16x128xf32>, vector<64x128xf32> -> vector<64x128xf32>
    %c0_6 = arith.constant 0 : index
    %c0_7 = arith.constant 0 : index
    %5 = vector.load %arg4[%c0_6, %c0_7] : memref<1x128xf32, #tpu.memory_space<vmem>>, vector<1x128xf32>
    %6 = vector.broadcast %5 : vector<1x128xf32> to vector<64x128xf32>
    %7 = arith.addf %4, %6 : vector<64x128xf32>
    %8 = vector.extract_strided_slice %1 {offsets = [56, 0], sizes = [8, 16], strides = [1, 1]} : vector<64x16xf32> to vector<8x16xf32>
    %c0_8 = arith.constant 0 : index
    %c0_9 = arith.constant 0 : index
    %9 = vector.load %arg6[%c0_8, %c0_9] : memref<16x128xf32, #tpu.memory_space<vmem>>, vector<16x128xf32>
    %cst_10 = arith.constant dense<0.000000e+00> : vector<8x128xf32>
    %10 = tpu.matmul %8, %9, %cst_10 {dimension_numbers = #tpu.dot_dimension_numbers<[1], [0], [0], [1], [0, 0, 1, 1], [], []>} : vector<8x16xf32>, vector<16x128xf32>, vector<8x128xf32> -> vector<8x128xf32>
    %c0_11 = arith.constant 0 : index
    %c0_12 = arith.constant 0 : index
    %11 = vector.load %arg7[%c0_11, %c0_12] : memref<1x128xf32, #tpu.memory_space<vmem>>, vector<1x128xf32>
    %12 = vector.broadcast %11 : vector<1x128xf32> to vector<8x128xf32>
    %13 = arith.addf %10, %12 : vector<8x128xf32>
    %14 = vector.extract_strided_slice %7 {offsets = [0, 0], sizes = [8, 128], strides = [1, 1]} : vector<64x128xf32> to vector<8x128xf32>
    %cst_13 = arith.constant 0.000000e+00 : f32
    %15 = vector.broadcast %cst_13 : f32 to vector<8x32xf32>
    %16 = math.tanh %14 : vector<8x128xf32>
    %17 = vector.extract_strided_slice %16 {offsets = [0, 0], sizes = [8, 96], strides = [1, 1]} : vector<8x128xf32> to vector<8x96xf32>
    %cst_14 = arith.constant 5.000000e-01 : f32
    %18 = vector.broadcast %cst_14 : f32 to vector<8x96xf32>
    %19 = arith.mulf %18, %17 : vector<8x96xf32>
    %cst_15 = arith.constant 5.000000e-01 : f32
    %20 = vector.broadcast %cst_15 : f32 to vector<8x96xf32>
    %21 = arith.addf %19, %20 : vector<8x96xf32>
    %22 = vector.extract_strided_slice %21 {offsets = [0, 0], sizes = [8, 32], strides = [1, 1]} : vector<8x96xf32> to vector<8x32xf32>
    %23 = vector.extract_strided_slice %21 {offsets = [0, 32], sizes = [8, 32], strides = [1, 1]} : vector<8x96xf32> to vector<8x32xf32>
    %24 = vector.extract_strided_slice %21 {offsets = [0, 64], sizes = [8, 32], strides = [1, 1]} : vector<8x96xf32> to vector<8x32xf32>
    %25 = vector.extract_strided_slice %16 {offsets = [0, 96], sizes = [8, 32], strides = [1, 1]} : vector<8x128xf32> to vector<8x32xf32>
    %26 = arith.mulf %23, %15 : vector<8x32xf32>
    %27 = arith.mulf %22, %25 : vector<8x32xf32>
    %28 = arith.addf %26, %27 : vector<8x32xf32>
    %29 = math.tanh %28 : vector<8x32xf32>
    %30 = arith.mulf %24, %29 : vector<8x32xf32>
    %31 = vector.extract_strided_slice %7 {offsets = [8, 0], sizes = [8, 128], strides = [1, 1]} : vector<64x128xf32> to vector<8x128xf32>
    %cst_16 = arith.constant dense<0.000000e+00> : vector<8x128xf32>
    %32 = tpu.matmul %30, %2, %cst_16 {dimension_numbers = #tpu.dot_dimension_numbers<[1], [0], [0], [1], [0, 0, 1, 1], [], []>} : vector<8x32xf32>, vector<32x128xf32>, vector<8x128xf32> -> vector<8x128xf32>
    %33 = arith.addf %31, %32 : vector<8x128xf32>
    %34 = math.tanh %33 : vector<8x128xf32>
    %35 = vector.extract_strided_slice %34 {offsets = [0, 0], sizes = [8, 96], strides = [1, 1]} : vector<8x128xf32> to vector<8x96xf32>
    %cst_17 = arith.constant 5.000000e-01 : f32
    %36 = vector.broadcast %cst_17 : f32 to vector<8x96xf32>
    %37 = arith.mulf %36, %35 : vector<8x96xf32>
    %cst_18 = arith.constant 5.000000e-01 : f32
    %38 = vector.broadcast %cst_18 : f32 to vector<8x96xf32>
    %39 = arith.addf %37, %38 : vector<8x96xf32>
    %40 = vector.extract_strided_slice %39 {offsets = [0, 0], sizes = [8, 32], strides = [1, 1]} : vector<8x96xf32> to vector<8x32xf32>
    %41 = vector.extract_strided_slice %39 {offsets = [0, 32], sizes = [8, 32], strides = [1, 1]} : vector<8x96xf32> to vector<8x32xf32>
    %42 = vector.extract_strided_slice %39 {offsets = [0, 64], sizes = [8, 32], strides = [1, 1]} : vector<8x96xf32> to vector<8x32xf32>
    %43 = vector.extract_strided_slice %34 {offsets = [0, 96], sizes = [8, 32], strides = [1, 1]} : vector<8x128xf32> to vector<8x32xf32>
    %44 = arith.mulf %41, %28 : vector<8x32xf32>
    %45 = arith.mulf %40, %43 : vector<8x32xf32>
    %46 = arith.addf %44, %45 : vector<8x32xf32>
    %47 = math.tanh %46 : vector<8x32xf32>
    %48 = arith.mulf %42, %47 : vector<8x32xf32>
    %49 = vector.extract_strided_slice %7 {offsets = [16, 0], sizes = [8, 128], strides = [1, 1]} : vector<64x128xf32> to vector<8x128xf32>
    %cst_19 = arith.constant dense<0.000000e+00> : vector<8x128xf32>
    %50 = tpu.matmul %48, %2, %cst_19 {dimension_numbers = #tpu.dot_dimension_numbers<[1], [0], [0], [1], [0, 0, 1, 1], [], []>} : vector<8x32xf32>, vector<32x128xf32>, vector<8x128xf32> -> vector<8x128xf32>
    %51 = arith.addf %49, %50 : vector<8x128xf32>
    %52 = math.tanh %51 : vector<8x128xf32>
    %53 = vector.extract_strided_slice %52 {offsets = [0, 0], sizes = [8, 96], strides = [1, 1]} : vector<8x128xf32> to vector<8x96xf32>
    %cst_20 = arith.constant 5.000000e-01 : f32
    %54 = vector.broadcast %cst_20 : f32 to vector<8x96xf32>
    %55 = arith.mulf %54, %53 : vector<8x96xf32>
    %cst_21 = arith.constant 5.000000e-01 : f32
    %56 = vector.broadcast %cst_21 : f32 to vector<8x96xf32>
    %57 = arith.addf %55, %56 : vector<8x96xf32>
    %58 = vector.extract_strided_slice %57 {offsets = [0, 0], sizes = [8, 32], strides = [1, 1]} : vector<8x96xf32> to vector<8x32xf32>
    %59 = vector.extract_strided_slice %57 {offsets = [0, 32], sizes = [8, 32], strides = [1, 1]} : vector<8x96xf32> to vector<8x32xf32>
    %60 = vector.extract_strided_slice %57 {offsets = [0, 64], sizes = [8, 32], strides = [1, 1]} : vector<8x96xf32> to vector<8x32xf32>
    %61 = vector.extract_strided_slice %52 {offsets = [0, 96], sizes = [8, 32], strides = [1, 1]} : vector<8x128xf32> to vector<8x32xf32>
    %62 = arith.mulf %59, %46 : vector<8x32xf32>
    %63 = arith.mulf %58, %61 : vector<8x32xf32>
    %64 = arith.addf %62, %63 : vector<8x32xf32>
    %65 = math.tanh %64 : vector<8x32xf32>
    %66 = arith.mulf %60, %65 : vector<8x32xf32>
    %67 = vector.extract_strided_slice %7 {offsets = [24, 0], sizes = [8, 128], strides = [1, 1]} : vector<64x128xf32> to vector<8x128xf32>
    %cst_22 = arith.constant dense<0.000000e+00> : vector<8x128xf32>
    %68 = tpu.matmul %66, %2, %cst_22 {dimension_numbers = #tpu.dot_dimension_numbers<[1], [0], [0], [1], [0, 0, 1, 1], [], []>} : vector<8x32xf32>, vector<32x128xf32>, vector<8x128xf32> -> vector<8x128xf32>
    %69 = arith.addf %67, %68 : vector<8x128xf32>
    %70 = math.tanh %69 : vector<8x128xf32>
    %71 = vector.extract_strided_slice %70 {offsets = [0, 0], sizes = [8, 96], strides = [1, 1]} : vector<8x128xf32> to vector<8x96xf32>
    %cst_23 = arith.constant 5.000000e-01 : f32
    %72 = vector.broadcast %cst_23 : f32 to vector<8x96xf32>
    %73 = arith.mulf %72, %71 : vector<8x96xf32>
    %cst_24 = arith.constant 5.000000e-01 : f32
    %74 = vector.broadcast %cst_24 : f32 to vector<8x96xf32>
    %75 = arith.addf %73, %74 : vector<8x96xf32>
    %76 = vector.extract_strided_slice %75 {offsets = [0, 0], sizes = [8, 32], strides = [1, 1]} : vector<8x96xf32> to vector<8x32xf32>
    %77 = vector.extract_strided_slice %75 {offsets = [0, 32], sizes = [8, 32], strides = [1, 1]} : vector<8x96xf32> to vector<8x32xf32>
    %78 = vector.extract_strided_slice %75 {offsets = [0, 64], sizes = [8, 32], strides = [1, 1]} : vector<8x96xf32> to vector<8x32xf32>
    %79 = vector.extract_strided_slice %70 {offsets = [0, 96], sizes = [8, 32], strides = [1, 1]} : vector<8x128xf32> to vector<8x32xf32>
    %80 = arith.mulf %77, %64 : vector<8x32xf32>
    %81 = arith.mulf %76, %79 : vector<8x32xf32>
    %82 = arith.addf %80, %81 : vector<8x32xf32>
    %83 = math.tanh %82 : vector<8x32xf32>
    %84 = arith.mulf %78, %83 : vector<8x32xf32>
    %85 = vector.extract_strided_slice %7 {offsets = [32, 0], sizes = [8, 128], strides = [1, 1]} : vector<64x128xf32> to vector<8x128xf32>
    %cst_25 = arith.constant dense<0.000000e+00> : vector<8x128xf32>
    %86 = tpu.matmul %84, %2, %cst_25 {dimension_numbers = #tpu.dot_dimension_numbers<[1], [0], [0], [1], [0, 0, 1, 1], [], []>} : vector<8x32xf32>, vector<32x128xf32>, vector<8x128xf32> -> vector<8x128xf32>
    %87 = arith.addf %85, %86 : vector<8x128xf32>
    %88 = math.tanh %87 : vector<8x128xf32>
    %89 = vector.extract_strided_slice %88 {offsets = [0, 0], sizes = [8, 96], strides = [1, 1]} : vector<8x128xf32> to vector<8x96xf32>
    %cst_26 = arith.constant 5.000000e-01 : f32
    %90 = vector.broadcast %cst_26 : f32 to vector<8x96xf32>
    %91 = arith.mulf %90, %89 : vector<8x96xf32>
    %cst_27 = arith.constant 5.000000e-01 : f32
    %92 = vector.broadcast %cst_27 : f32 to vector<8x96xf32>
    %93 = arith.addf %91, %92 : vector<8x96xf32>
    %94 = vector.extract_strided_slice %93 {offsets = [0, 0], sizes = [8, 32], strides = [1, 1]} : vector<8x96xf32> to vector<8x32xf32>
    %95 = vector.extract_strided_slice %93 {offsets = [0, 32], sizes = [8, 32], strides = [1, 1]} : vector<8x96xf32> to vector<8x32xf32>
    %96 = vector.extract_strided_slice %93 {offsets = [0, 64], sizes = [8, 32], strides = [1, 1]} : vector<8x96xf32> to vector<8x32xf32>
    %97 = vector.extract_strided_slice %88 {offsets = [0, 96], sizes = [8, 32], strides = [1, 1]} : vector<8x128xf32> to vector<8x32xf32>
    %98 = arith.mulf %95, %82 : vector<8x32xf32>
    %99 = arith.mulf %94, %97 : vector<8x32xf32>
    %100 = arith.addf %98, %99 : vector<8x32xf32>
    %101 = math.tanh %100 : vector<8x32xf32>
    %102 = arith.mulf %96, %101 : vector<8x32xf32>
    %103 = vector.extract_strided_slice %7 {offsets = [40, 0], sizes = [8, 128], strides = [1, 1]} : vector<64x128xf32> to vector<8x128xf32>
    %cst_28 = arith.constant dense<0.000000e+00> : vector<8x128xf32>
    %104 = tpu.matmul %102, %2, %cst_28 {dimension_numbers = #tpu.dot_dimension_numbers<[1], [0], [0], [1], [0, 0, 1, 1], [], []>} : vector<8x32xf32>, vector<32x128xf32>, vector<8x128xf32> -> vector<8x128xf32>
    %105 = arith.addf %103, %104 : vector<8x128xf32>
    %106 = math.tanh %105 : vector<8x128xf32>
    %107 = vector.extract_strided_slice %106 {offsets = [0, 0], sizes = [8, 96], strides = [1, 1]} : vector<8x128xf32> to vector<8x96xf32>
    %cst_29 = arith.constant 5.000000e-01 : f32
    %108 = vector.broadcast %cst_29 : f32 to vector<8x96xf32>
    %109 = arith.mulf %108, %107 : vector<8x96xf32>
    %cst_30 = arith.constant 5.000000e-01 : f32
    %110 = vector.broadcast %cst_30 : f32 to vector<8x96xf32>
    %111 = arith.addf %109, %110 : vector<8x96xf32>
    %112 = vector.extract_strided_slice %111 {offsets = [0, 0], sizes = [8, 32], strides = [1, 1]} : vector<8x96xf32> to vector<8x32xf32>
    %113 = vector.extract_strided_slice %111 {offsets = [0, 32], sizes = [8, 32], strides = [1, 1]} : vector<8x96xf32> to vector<8x32xf32>
    %114 = vector.extract_strided_slice %111 {offsets = [0, 64], sizes = [8, 32], strides = [1, 1]} : vector<8x96xf32> to vector<8x32xf32>
    %115 = vector.extract_strided_slice %106 {offsets = [0, 96], sizes = [8, 32], strides = [1, 1]} : vector<8x128xf32> to vector<8x32xf32>
    %116 = arith.mulf %113, %100 : vector<8x32xf32>
    %117 = arith.mulf %112, %115 : vector<8x32xf32>
    %118 = arith.addf %116, %117 : vector<8x32xf32>
    %119 = math.tanh %118 : vector<8x32xf32>
    %120 = arith.mulf %114, %119 : vector<8x32xf32>
    %121 = vector.extract_strided_slice %7 {offsets = [48, 0], sizes = [8, 128], strides = [1, 1]} : vector<64x128xf32> to vector<8x128xf32>
    %cst_31 = arith.constant dense<0.000000e+00> : vector<8x128xf32>
    %122 = tpu.matmul %120, %2, %cst_31 {dimension_numbers = #tpu.dot_dimension_numbers<[1], [0], [0], [1], [0, 0, 1, 1], [], []>} : vector<8x32xf32>, vector<32x128xf32>, vector<8x128xf32> -> vector<8x128xf32>
    %123 = arith.addf %121, %122 : vector<8x128xf32>
    %124 = math.tanh %123 : vector<8x128xf32>
    %125 = vector.extract_strided_slice %124 {offsets = [0, 0], sizes = [8, 96], strides = [1, 1]} : vector<8x128xf32> to vector<8x96xf32>
    %cst_32 = arith.constant 5.000000e-01 : f32
    %126 = vector.broadcast %cst_32 : f32 to vector<8x96xf32>
    %127 = arith.mulf %126, %125 : vector<8x96xf32>
    %cst_33 = arith.constant 5.000000e-01 : f32
    %128 = vector.broadcast %cst_33 : f32 to vector<8x96xf32>
    %129 = arith.addf %127, %128 : vector<8x96xf32>
    %130 = vector.extract_strided_slice %129 {offsets = [0, 0], sizes = [8, 32], strides = [1, 1]} : vector<8x96xf32> to vector<8x32xf32>
    %131 = vector.extract_strided_slice %129 {offsets = [0, 32], sizes = [8, 32], strides = [1, 1]} : vector<8x96xf32> to vector<8x32xf32>
    %132 = vector.extract_strided_slice %129 {offsets = [0, 64], sizes = [8, 32], strides = [1, 1]} : vector<8x96xf32> to vector<8x32xf32>
    %133 = vector.extract_strided_slice %124 {offsets = [0, 96], sizes = [8, 32], strides = [1, 1]} : vector<8x128xf32> to vector<8x32xf32>
    %134 = arith.mulf %131, %118 : vector<8x32xf32>
    %135 = arith.mulf %130, %133 : vector<8x32xf32>
    %136 = arith.addf %134, %135 : vector<8x32xf32>
    %137 = math.tanh %136 : vector<8x32xf32>
    %138 = arith.mulf %132, %137 : vector<8x32xf32>
    %139 = vector.extract_strided_slice %7 {offsets = [56, 0], sizes = [8, 128], strides = [1, 1]} : vector<64x128xf32> to vector<8x128xf32>
    %cst_34 = arith.constant dense<0.000000e+00> : vector<8x128xf32>
    %140 = tpu.matmul %138, %2, %cst_34 {dimension_numbers = #tpu.dot_dimension_numbers<[1], [0], [0], [1], [0, 0, 1, 1], [], []>} : vector<8x32xf32>, vector<32x128xf32>, vector<8x128xf32> -> vector<8x128xf32>
    %141 = arith.addf %139, %140 : vector<8x128xf32>
    %142 = math.tanh %141 : vector<8x128xf32>
    %143 = vector.extract_strided_slice %142 {offsets = [0, 0], sizes = [8, 96], strides = [1, 1]} : vector<8x128xf32> to vector<8x96xf32>
    %cst_35 = arith.constant 5.000000e-01 : f32
    %144 = vector.broadcast %cst_35 : f32 to vector<8x96xf32>
    %145 = arith.mulf %144, %143 : vector<8x96xf32>
    %cst_36 = arith.constant 5.000000e-01 : f32
    %146 = vector.broadcast %cst_36 : f32 to vector<8x96xf32>
    %147 = arith.addf %145, %146 : vector<8x96xf32>
    %148 = vector.extract_strided_slice %147 {offsets = [0, 0], sizes = [8, 32], strides = [1, 1]} : vector<8x96xf32> to vector<8x32xf32>
    %149 = vector.extract_strided_slice %147 {offsets = [0, 32], sizes = [8, 32], strides = [1, 1]} : vector<8x96xf32> to vector<8x32xf32>
    %150 = vector.extract_strided_slice %147 {offsets = [0, 64], sizes = [8, 32], strides = [1, 1]} : vector<8x96xf32> to vector<8x32xf32>
    %151 = vector.extract_strided_slice %142 {offsets = [0, 96], sizes = [8, 32], strides = [1, 1]} : vector<8x128xf32> to vector<8x32xf32>
    %152 = arith.mulf %149, %136 : vector<8x32xf32>
    %153 = arith.mulf %148, %151 : vector<8x32xf32>
    %154 = arith.addf %152, %153 : vector<8x32xf32>
    %155 = math.tanh %154 : vector<8x32xf32>
    %156 = arith.mulf %150, %155 : vector<8x32xf32>
    %cst_37 = arith.constant 0.000000e+00 : f32
    %157 = vector.broadcast %cst_37 : f32 to vector<8x32xf32>
    %158 = math.tanh %13 : vector<8x128xf32>
    %159 = vector.extract_strided_slice %158 {offsets = [0, 0], sizes = [8, 96], strides = [1, 1]} : vector<8x128xf32> to vector<8x96xf32>
    %cst_38 = arith.constant 5.000000e-01 : f32
    %160 = vector.broadcast %cst_38 : f32 to vector<8x96xf32>
    %161 = arith.mulf %160, %159 : vector<8x96xf32>
    %cst_39 = arith.constant 5.000000e-01 : f32
    %162 = vector.broadcast %cst_39 : f32 to vector<8x96xf32>
    %163 = arith.addf %161, %162 : vector<8x96xf32>
    %164 = vector.extract_strided_slice %163 {offsets = [0, 0], sizes = [8, 32], strides = [1, 1]} : vector<8x96xf32> to vector<8x32xf32>
    %165 = vector.extract_strided_slice %163 {offsets = [0, 32], sizes = [8, 32], strides = [1, 1]} : vector<8x96xf32> to vector<8x32xf32>
    %166 = vector.extract_strided_slice %163 {offsets = [0, 64], sizes = [8, 32], strides = [1, 1]} : vector<8x96xf32> to vector<8x32xf32>
    %167 = vector.extract_strided_slice %158 {offsets = [0, 96], sizes = [8, 32], strides = [1, 1]} : vector<8x128xf32> to vector<8x32xf32>
    %168 = arith.mulf %165, %157 : vector<8x32xf32>
    %169 = arith.mulf %164, %167 : vector<8x32xf32>
    %170 = arith.addf %168, %169 : vector<8x32xf32>
    %171 = math.tanh %170 : vector<8x32xf32>
    %172 = arith.mulf %166, %171 : vector<8x32xf32>
    %173 = tpu.concatenate %156, %172 in 1 : vector<8x32xf32>, vector<8x32xf32> -> vector<8x64xf32>
    %c0_40 = arith.constant 0 : index
    %c0_41 = arith.constant 0 : index
    %174 = vector.load %arg8[%c0_40, %c0_41] : memref<64x32xf32, #tpu.memory_space<vmem>>, vector<64x32xf32>
    %cst_42 = arith.constant dense<0.000000e+00> : vector<8x32xf32>
    %175 = tpu.matmul %173, %174, %cst_42 {dimension_numbers = #tpu.dot_dimension_numbers<[1], [0], [0], [1], [0, 0, 1, 1], [], []>} : vector<8x64xf32>, vector<64x32xf32>, vector<8x32xf32> -> vector<8x32xf32>
    %c0_43 = arith.constant 0 : index
    %c0_44 = arith.constant 0 : index
    %176 = vector.load %arg9[%c0_43, %c0_44] : memref<1x32xf32, #tpu.memory_space<vmem>>, vector<1x32xf32>
    %177 = vector.broadcast %176 : vector<1x32xf32> to vector<8x32xf32>
    %178 = arith.addf %175, %177 : vector<8x32xf32>
    %c0_45 = arith.constant 0 : index
    %c0_46 = arith.constant 0 : index
    %179 = vector.load %arg2[%c0_45, %c0_46] : memref<8x8xf32, #tpu.memory_space<vmem>>, vector<8x8xf32>
    %180 = tpu.concatenate %178, %179 in 1 : vector<8x32xf32>, vector<8x8xf32> -> vector<8x40xf32>
    %c0_47 = arith.constant 0 : index
    %c0_48 = arith.constant 0 : index
    %181 = vector.load %arg10[%c0_47, %c0_48] : memref<40x64xf32, #tpu.memory_space<vmem>>, vector<40x64xf32>
    %cst_49 = arith.constant dense<0.000000e+00> : vector<8x64xf32>
    %182 = tpu.matmul %180, %181, %cst_49 {dimension_numbers = #tpu.dot_dimension_numbers<[1], [0], [0], [1], [0, 0, 1, 1], [], []>} : vector<8x40xf32>, vector<40x64xf32>, vector<8x64xf32> -> vector<8x64xf32>
    %c0_50 = arith.constant 0 : index
    %c0_51 = arith.constant 0 : index
    %183 = vector.load %arg11[%c0_50, %c0_51] : memref<1x64xf32, #tpu.memory_space<vmem>>, vector<1x64xf32>
    %184 = vector.broadcast %183 : vector<1x64xf32> to vector<8x64xf32>
    %185 = arith.addf %182, %184 : vector<8x64xf32>
    %cst_52 = arith.constant 0.000000e+00 : f32
    %186 = vector.broadcast %cst_52 : f32 to vector<8x64xf32>
    %187 = arith.maximumf %185, %186 : vector<8x64xf32>
    %c0_53 = arith.constant 0 : index
    %c0_54 = arith.constant 0 : index
    %188 = vector.load %arg12[%c0_53, %c0_54] : memref<64x64xf32, #tpu.memory_space<vmem>>, vector<64x64xf32>
    %cst_55 = arith.constant dense<0.000000e+00> : vector<8x64xf32>
    %189 = tpu.matmul %187, %188, %cst_55 {dimension_numbers = #tpu.dot_dimension_numbers<[1], [0], [0], [1], [0, 0, 1, 1], [], []>} : vector<8x64xf32>, vector<64x64xf32>, vector<8x64xf32> -> vector<8x64xf32>
    %c0_56 = arith.constant 0 : index
    %c0_57 = arith.constant 0 : index
    %190 = vector.load %arg13[%c0_56, %c0_57] : memref<1x64xf32, #tpu.memory_space<vmem>>, vector<1x64xf32>
    %191 = vector.broadcast %190 : vector<1x64xf32> to vector<8x64xf32>
    %192 = arith.addf %189, %191 : vector<8x64xf32>
    %cst_58 = arith.constant 0.000000e+00 : f32
    %193 = vector.broadcast %cst_58 : f32 to vector<8x64xf32>
    %194 = arith.maximumf %192, %193 : vector<8x64xf32>
    %c0_59 = arith.constant 0 : index
    %c0_60 = arith.constant 0 : index
    %195 = vector.load %arg14[%c0_59, %c0_60] : memref<64x2xf32, #tpu.memory_space<vmem>>, vector<64x2xf32>
    %cst_61 = arith.constant dense<0.000000e+00> : vector<8x2xf32>
    %196 = tpu.matmul %194, %195, %cst_61 {dimension_numbers = #tpu.dot_dimension_numbers<[1], [0], [0], [1], [0, 0, 1, 1], [], []>} : vector<8x64xf32>, vector<64x2xf32>, vector<8x2xf32> -> vector<8x2xf32>
    %c0_62 = arith.constant 0 : index
    %c0_63 = arith.constant 0 : index
    %197 = vector.load %arg15[%c0_62, %c0_63] : memref<1x2xf32, #tpu.memory_space<vmem>>, vector<1x2xf32>
    %198 = vector.broadcast %197 : vector<1x2xf32> to vector<8x2xf32>
    %199 = arith.addf %196, %198 : vector<8x2xf32>
    %c0_64 = arith.constant 0 : index
    %c0_65 = arith.constant 0 : index
    %200 = vector.load %arg16[%c0_64, %c0_65] : memref<8x2xf32, #tpu.memory_space<vmem>>, vector<8x2xf32>
    tpu.vector_store %arg16[%c0_64, %c0_65], %199 {strides = array<i32>} : memref<8x2xf32, #tpu.memory_space<vmem>>, vector<8x2xf32>,
    return
  }
  func.func @transform_0(%arg0: i32) -> (i32, i32, i32) {
    %c0_i32 = arith.constant 0 : i32
    %c0_i32_0 = arith.constant 0 : i32
    %c0_i32_1 = arith.constant 0 : i32
    return %arg0, %c0_i32, %c0_i32_0 : i32, i32, i32
  }
  func.func @transform_1(%arg0: i32) -> (i32, i32) {
    %c0_i32 = arith.constant 0 : i32
    %c0_i32_0 = arith.constant 0 : i32
    return %arg0, %c0_i32 : i32, i32
  }
  func.func @transform_2(%arg0: i32) -> (i32, i32) {
    %c0_i32 = arith.constant 0 : i32
    %c0_i32_0 = arith.constant 0 : i32
    %c0_i32_1 = arith.constant 0 : i32
    return %c0_i32, %c0_i32_0 : i32, i32
  }
  func.func @transform_3(%arg0: i32) -> (i32, i32) {
    %c0_i32 = arith.constant 0 : i32
    %c0_i32_0 = arith.constant 0 : i32
    %c0_i32_1 = arith.constant 0 : i32
    return %c0_i32, %c0_i32_0 : i32, i32
  }
  func.func @transform_4(%arg0: i32) -> (i32, i32) {
    %c0_i32 = arith.constant 0 : i32
    %c0_i32_0 = arith.constant 0 : i32
    %c0_i32_1 = arith.constant 0 : i32
    return %c0_i32, %c0_i32_0 : i32, i32
  }
  func.func @transform_5(%arg0: i32) -> (i32, i32) {
    %c0_i32 = arith.constant 0 : i32
    %c0_i32_0 = arith.constant 0 : i32
    %c0_i32_1 = arith.constant 0 : i32
    return %c0_i32, %c0_i32_0 : i32, i32
  }
  func.func @transform_6(%arg0: i32) -> (i32, i32) {
    %c0_i32 = arith.constant 0 : i32
    %c0_i32_0 = arith.constant 0 : i32
    %c0_i32_1 = arith.constant 0 : i32
    return %c0_i32, %c0_i32_0 : i32, i32
  }
  func.func @transform_7(%arg0: i32) -> (i32, i32) {
    %c0_i32 = arith.constant 0 : i32
    %c0_i32_0 = arith.constant 0 : i32
    %c0_i32_1 = arith.constant 0 : i32
    return %c0_i32, %c0_i32_0 : i32, i32
  }
  func.func @transform_8(%arg0: i32) -> (i32, i32) {
    %c0_i32 = arith.constant 0 : i32
    %c0_i32_0 = arith.constant 0 : i32
    %c0_i32_1 = arith.constant 0 : i32
    return %c0_i32, %c0_i32_0 : i32, i32
  }
  func.func @transform_9(%arg0: i32) -> (i32, i32) {
    %c0_i32 = arith.constant 0 : i32
    %c0_i32_0 = arith.constant 0 : i32
    %c0_i32_1 = arith.constant 0 : i32
    return %c0_i32, %c0_i32_0 : i32, i32
  }
  func.func @transform_10(%arg0: i32) -> (i32, i32) {
    %c0_i32 = arith.constant 0 : i32
    %c0_i32_0 = arith.constant 0 : i32
    %c0_i32_1 = arith.constant 0 : i32
    return %c0_i32, %c0_i32_0 : i32, i32
  }
  func.func @transform_11(%arg0: i32) -> (i32, i32) {
    %c0_i32 = arith.constant 0 : i32
    %c0_i32_0 = arith.constant 0 : i32
    %c0_i32_1 = arith.constant 0 : i32
    return %c0_i32, %c0_i32_0 : i32, i32
  }
  func.func @transform_12(%arg0: i32) -> (i32, i32) {
    %c0_i32 = arith.constant 0 : i32
    %c0_i32_0 = arith.constant 0 : i32
    %c0_i32_1 = arith.constant 0 : i32
    return %c0_i32, %c0_i32_0 : i32, i32
  }
  func.func @transform_13(%arg0: i32) -> (i32, i32) {
    %c0_i32 = arith.constant 0 : i32
    %c0_i32_0 = arith.constant 0 : i32
    %c0_i32_1 = arith.constant 0 : i32
    return %c0_i32, %c0_i32_0 : i32, i32
  }
  func.func @transform_14(%arg0: i32) -> (i32, i32) {
    %c0_i32 = arith.constant 0 : i32
    %c0_i32_0 = arith.constant 0 : i32
    %c0_i32_1 = arith.constant 0 : i32
    return %c0_i32, %c0_i32_0 : i32, i32
  }
  func.func @transform_15(%arg0: i32) -> (i32, i32) {
    %c0_i32 = arith.constant 0 : i32
    %c0_i32_0 = arith.constant 0 : i32
    return %arg0, %c0_i32 : i32, i32
  }
}

</mosaic_0001>

<bundles_post_ra>
// kernel: tpu_custom_call.1
= control target key start
LH: loop header
LB: loop body
LE: loop exit
PB: predicated region body
PF: predicated region fallthrough
CT: control target
= control target key end

     0   :  { %vm71_vm0 = vcmask 130048   ;;  %v1778_v17 = vmov 0.0|0.0   ;;  %vm1779_vm1 = vmmov 0   ;;  %v1780_v20 = vmov 0.0   ;;  %s2176_s2 = inlined_call_operand.vmem [shape: f32[16,128], index: 2, kind: input, shape index: {}]   ;;  %s2177_s0 = inlined_call_operand.vmem [shape: f32[1,64,16], index: 0, kind: input, shape index: {}]   ;;  %s2178_s3 = inlined_call_operand.vmem [shape: f32[1,128], index: 3, kind: input, shape index: {}]   ;;  %s2179_s5 = inlined_call_operand.vmem [shape: f32[16,128], index: 5, kind: input, shape index: {}]   ;;  %s2180_s4 = inlined_call_operand.vmem [shape: f32[32,128], index: 4, kind: input, shape index: {}]   ;;  %s2181_s6 = inlined_call_operand.vmem [shape: f32[1,128], index: 6, kind: input, shape index: {}]   ;;  %s2182_s7 = inlined_call_operand.vmem [shape: f32[64,32], index: 7, kind: input, shape index: {}]   ;;  %s2183_s9 = inlined_call_operand.vmem [shape: f32[40,64], index: 9, kind: input, shape index: {}]   ;;  %s2184_s1 = inlined_call_operand.vmem [shape: f32[8,8], index: 1, kind: input, shape index: {}]   ;;  %s2185_s8 = inlined_call_operand.vmem [shape: f32[1,32], index: 8, kind: input, shape index: {}]   ;;  %s2186_s11 = inlined_call_operand.vmem [shape: f32[64,64], index: 11, kind: input, shape index: {}]   ;;  %s2187_s13 = inlined_call_operand.vmem [shape: f32[64,2], index: 13, kind: input, shape index: {}]   ;;  %s2188_s10 = inlined_call_operand.vmem [shape: f32[1,64], index: 10, kind: input, shape index: {}]   ;;  %s2189_s12 = inlined_call_operand.vmem [shape: f32[1,64], index: 12, kind: input, shape index: {}]   ;;  %s2190_s14 = inlined_call_operand.vmem [shape: f32[1,2], index: 14, kind: input, shape index: {}]   ;;  %s2191_s15 = inlined_call_operand.vmem [shape: f32[8,2], index: 15, kind: output, shape index: {}]  }
   0x1   :  { %v62_v0 = vld [vmem:[%s2176_s2] sm:$0xff]  ;;  %v63_v1 = vld [vmem:[%s2176_s2 + $0x8] sm:$0xff]  ;;  %s1777_s2 = smov 32   ;;  %1648 = vmatprep.subr.bf16.mxu1 %v1778_v17  ;;  %1494 = vmatprep.mubr.msk.f32.mxu1 %vm1779_vm1, %v1780_v20  ;;  %v57_v25 = vld [vmem:[%s2177_s0 + $0x38] sm:$0xff]  ;;  %vm303_vm2 = vcmask 261120   ;;  %vm1017_vm3 = vcmask 523264  }
   0x2   :  { %v50_v2 = vld [vmem:[%s2177_s0] sm:$0xff]  ;;  %v1644_v3 = vpack.c.bf16 %v63_v1, %v62_v0  ;;  %v51_v4 = vld [vmem:[%s2177_s0 + $0x8] sm:$0xff]  ;;  %v60_v26 = vld [vmem:[%s2180_s4 + $0x10] sm:$0xff]  ;;  %vm1109_vm4 = vcmask 326656   ;;  %vm1361_vm5 = vcmask 15360  }
   0x3   :  { %1478 = vmatprep.mubr.msk.f32.mxu0 %vm71_vm0, %v50_v2  ;;  %v1880_v5 = vld [vmem:[%s2178_s3] ss:$0 sm:$0xff]  ;;  %v202_v19 = vld [vmem:[%s2179_s5 + $0x8] sm:$0xff]  ;;  %v61_v27 = vld [vmem:[%s2180_s4 + $0x18] sm:$0xff] }
   0x4   :  { %1645 = vmatprep.subr.bf16.mxu0 %v1644_v3  ;;  %v201_v18 = vld [vmem:[%s2179_s5] sm:$0xff]  ;;  %v59_v23 = vld [vmem:[%s2180_s4 + $0x8] sm:$0xff]  ;;  %v1916_v28 = vpack.c.bf16 %v61_v27, %v60_v26  ;;  %v52_v47 = vld [vmem:[%s2177_s0 + $0x10] sm:$0xff] }
   0x5   :  { %1647 = vmatpush3.bf16.msra.mxu0 %v1644_v3  ;;  %v58_v21 = vld [vmem:[%s2180_s4] sm:$0xff]  ;;  %v1649_v22 = vpack.c.bf16 %v202_v19, %v201_v18  ;;  %s1781_s4 = smov 64   ;;  %v53_v48 = vld [vmem:[%s2177_s0 + $0x18] sm:$0xff]  ;;  %v55_v50 = vld [vmem:[%s2177_s0 + $0x28] sm:$0xff] }
   0x6   :  { %1657 = vmatprep.subr.bf16.mxu0 %v1778_v17  ;;  %v1901_v24 = vpack.c.bf16 %v59_v23, %v58_v21  ;;  %v54_v49 = vld [vmem:[%s2177_s0 + $0x20] sm:$0xff]  ;;  %v56_v51 = vld [vmem:[%s2177_s0 + $0x30] sm:$0xff] }
   0x7   :  { %1650 = vmatpush3.bf16.msra.mxu1 %v1649_v22 }
   0x8   :  { %1479 = vmatmul.mubr.msk.f32.vlgmr.msra.gmra.mrb[0].mxu0 %vm71_vm0, %v51_v4  ;;  %1651 = vmatprep.subr.bf16.mxu1 %v1778_v17 }
   0x9   :  { %1659 = vmatpush3.bf16.msra.mxu0 %v1901_v24  ;;  %1481 = vmatprep.mubr.msk.f32.mxu0 %vm71_vm0, %v52_v47 }
   0xa   :  { %1660 = vmatprep.subr.bf16.mxu0 %v1778_v17  ;;  %1495 = vmatmul.mubr.msk.f32.vlgmr.msra.gmra.mrb[0].mxu1 %vm71_vm0, %v57_v25 }
   0xb   :  { %1653 = vmatpush3.bf16.msra.mxu1 %v1901_v24  ;;  %1505 = vmatprep.mubr.msk.f32.mxu1 %vm1779_vm1, %v1780_v20 }
   0xc   :  { %1654 = vmatprep.subr.bf16.mxu1 %v1778_v17  ;;  %1482 = vmatmul.mubr.msk.f32.gmra.mrb[2].mxu0 %vm71_vm0, %v53_v48 }
   0xd   :  { %1662 = vmatpush3.bf16.msra.mxu0 %v1916_v28  ;;  %1484 = vmatprep.mubr.msk.f32.mxu0 %vm71_vm0, %v54_v49 }
   0xe   :  { %1669 = vmatprep.subr.bf16.mxu0 %v1778_v17 }
   0xf   :  { %1656 = vmatpush3.bf16.msra.mxu1 %v1916_v28 }
  0x10   :  { %1663 = vmatprep.subr.bf16.mxu1 %v1778_v17  ;;  %1485 = vmatmul.mubr.msk.f32.gmra.mrb[4].mxu0 %vm71_vm0, %v55_v50 }
  0x11   :  { %1487 = vmatprep.mubr.msk.f32.mxu0 %vm71_vm0, %v56_v51 }
  0x14   :  { %1488 = vmatmul.mubr.msk.f32.gmra.mrb[6].mxu0 %vm71_vm0, %v57_v25 }
  0x15   :  { %1516 = vmatprep.mubr.msk.f32.mxu0 %vm1779_vm1, %v1780_v20 }
  0xdb   :  { %v1480_v6 = vpop.f32.mrb[0].mxu0 }
  0xdc   :  { %v162_v7 = vpop.f32.mrb[1].mxu0  ;;  %v168_v35 = vadd.f32 %v1480_v6, %v1880_v5 }
  0xdd   :  { %v163_v8 = vadd.f32 %v1880_v5, %v162_v7  ;;  %v1928_v32 = vpop.f32.mrb[0].mxu1 }
  0xde   :  { %v1496_v33 = vpop.f32.mrb[1].mxu1 }
  0xdf   :  { %1741 = vtanh.f32 %v163_v8  ;;  %v1483_v55 = vpop.f32.mrb[2].mxu0 }
  0xe0   :  { %v172_v56 = vpop.f32.mrb[3].mxu0 }
  0xe1   :  { %v173_v62 = vadd.f32 %v1880_v5, %v172_v56 }
  0xe3   :  { %v1965_v57 = vpop.f32.mrb[4].mxu0 }
  0xe4   :  { %v1967_v58 = vpop.f32.mrb[5].mxu0 }
  0xe7   :  { %v1969_v59 = vpop.f32.mrb[6].mxu0 }
  0xe8   :  { %v1971_v60 = vpop.f32.mrb[7].mxu0 }
  0xe9   :  { %v1742_v9 = vpop.eup %1741 }
  0xea   :  { %285 = vrot.lane.b32.xlu0 %v1742_v9, %s1777_s2  ;;  %v281_v10 = vmul.f32 0.5, %v1742_v9 }
  0xec   :  { %v282_v11 = vadd.f32 0.5, %v281_v10 }
  0xee   :  { %v283_v14 = vmul.f32 0.0, %v282_v11 }
 0x15c   :  { %v286_v12 = vpop.permute.xlu0 %285 }
 0x15d   :  { %v288_v13 = vmul.f32 %v286_v12, %v282_v11 }
 0x15f   :  { %290 = vrot.lane.b32.xlu0 %v288_v13, %s1777_s2 }
 0x1d1   :  { %v291_v15 = vpop.permute.xlu0 %290 }
 0x1d2   :  { %v293_v16 = vadd.f32 %v291_v15, %v283_v14  ;;  %v178_v15 = vadd.f32 %v1483_v55, %v1880_v5 }
 0x1d4   :  { %1743 = vtanh.f32 %v293_v16 }
 0x1de   :  { %v1744_v29 = vpop.eup %1743 }
 0x1df   :  { %296 = vrot.lane.b32.xlu1 %v1744_v29, %s1777_s2 }
 0x251   :  { %v297_v30 = vpop.permute.xlu1 %296 }
 0x252   :  { %v299_v31 = vmul.f32 %v297_v30, %v282_v11 }
 0x254   :  { %301 = vrot.lane.b32.xlu1 %v299_v31, %s1781_s4 }
 0x2c6   :  { %v302_v34 = vpop.permute.xlu1 %301 }
 0x2c7   :  { %1506 = vmatmul.mubr.msk.f32.vlgmr.msra.gmra.mrb[2].mxu1 %vm303_vm2, %v302_v34 }
 0x2c8   :  { %1665 = vmatpush3.bf16.msra.mxu1 %v1901_v24  ;;  %1527 = vmatprep.mubr.msk.f32.mxu1 %vm1779_vm1, %v1780_v20 }
 0x2c9   :  { %1666 = vmatprep.subr.bf16.mxu1 %v1778_v17 }
 0x2cc   :  { %1668 = vmatpush3.bf16.msra.mxu1 %v1916_v28 }
 0x2cd   :  { %1675 = vmatprep.subr.bf16.mxu1 %v1778_v17 }
 0x39a   :  { %v372_v36 = vpop.f32.mrb[2].mxu1 }
 0x39b   :  { %v376_v37 = vadd.f32 %v372_v36, %v168_v35  ;;  %v1507_v38 = vpop.f32.mrb[3].mxu1  ;;  %v183_v36 = vadd.f32 %v1880_v5, %v1967_v58 }
 0x39d   :  { %1745 = vtanh.f32 %v376_v37 }
 0x3a7   :  { %v1746_v39 = vpop.eup %1745 }
 0x3a8   :  { %382 = vrot.lane.b32.xlu0 %v1746_v39, %s1777_s2  ;;  %v378_v40 = vmul.f32 0.5, %v1746_v39 }
 0x3aa   :  { %v379_v41 = vadd.f32 0.5, %v378_v40 }
 0x3ac   :  { %v380_v44 = vmul.f32 %v379_v41, %v293_v16 }
 0x41a   :  { %v383_v42 = vpop.permute.xlu0 %382 }
 0x41b   :  { %v385_v43 = vmul.f32 %v383_v42, %v379_v41 }
 0x41d   :  { %387 = vrot.lane.b32.xlu1 %v385_v43, %s1777_s2 }
 0x48f   :  { %v388_v45 = vpop.permute.xlu1 %387 }
 0x490   :  { %v390_v46 = vadd.f32 %v388_v45, %v380_v44 }
 0x492   :  { %1747 = vtanh.f32 %v390_v46 }
 0x49c   :  { %v1748_v52 = vpop.eup %1747 }
 0x49d   :  { %393 = vrot.lane.b32.xlu0 %v1748_v52, %s1777_s2  ;;  %v188_v52 = vadd.f32 %v1965_v57, %v1880_v5 }
 0x50f   :  { %v394_v53 = vpop.permute.xlu0 %393 }
 0x510   :  { %v396_v54 = vmul.f32 %v394_v53, %v379_v41 }
 0x512   :  { %398 = vrot.lane.b32.xlu1 %v396_v54, %s1781_s4 }
 0x584   :  { %v399_v61 = vpop.permute.xlu1 %398 }
 0x585   :  { %1517 = vmatmul.mubr.msk.f32.vlgmr.msra.gmra.mrb[8].mxu0 %vm303_vm2, %v399_v61 }
 0x586   :  { %1671 = vmatpush3.bf16.msra.mxu0 %v1901_v24  ;;  %1538 = vmatprep.mubr.msk.f32.mxu0 %vm1779_vm1, %v1780_v20 }
 0x587   :  { %1672 = vmatprep.subr.bf16.mxu0 %v1778_v17 }
 0x58a   :  { %1674 = vmatpush3.bf16.msra.mxu0 %v1916_v28 }
 0x58b   :  { %1681 = vmatprep.subr.bf16.mxu0 %v1778_v17 }
 0x658   :  { %v468_v63 = vpop.f32.mrb[8].mxu0 }
 0x659   :  { %v472_v0 = vadd.f32 %v468_v63, %v173_v62  ;;  %v1518_v1 = vpop.f32.mrb[9].mxu0 }
 0x65b   :  { %1749 = vtanh.f32 %v472_v0 }
 0x665   :  { %v1750_v2 = vpop.eup %1749 }
 0x666   :  { %478 = vrot.lane.b32.xlu0 %v1750_v2, %s1777_s2  ;;  %v474_v3 = vmul.f32 0.5, %v1750_v2 }
 0x668   :  { %v475_v4 = vadd.f32 0.5, %v474_v3 }
 0x66a   :  { %v476_v8 = vmul.f32 %v475_v4, %v390_v46 }
 0x6d8   :  { %v479_v6 = vpop.permute.xlu0 %478 }
 0x6d9   :  { %v481_v7 = vmul.f32 %v479_v6, %v475_v4 }
 0x6db   :  { %483 = vrot.lane.b32.xlu1 %v481_v7, %s1777_s2 }
 0x74d   :  { %v484_v9 = vpop.permute.xlu1 %483 }
 0x74e   :  { %v486_v10 = vadd.f32 %v484_v9, %v476_v8 }
 0x750   :  { %1751 = vtanh.f32 %v486_v10 }
 0x75a   :  { %v1752_v11 = vpop.eup %1751 }
 0x75b   :  { %489 = vrot.lane.b32.xlu0 %v1752_v11, %s1777_s2 }
 0x7cd   :  { %v490_v12 = vpop.permute.xlu0 %489 }
 0x7ce   :  { %v492_v13 = vmul.f32 %v490_v12, %v475_v4  ;;  %v193_v4 = vadd.f32 %v1880_v5, %v1971_v60  ;;  %v1376_v60 = vld [vmem:[%s2181_s6] ss:$0 sm:$0xff]  ;;  %s1782_s6 = smov 96  }
 0x7d0   :  { %494 = vrot.lane.b32.xlu1 %v492_v13, %s1781_s4 }
 0x842   :  { %v495_v14 = vpop.permute.xlu1 %494 }
 0x843   :  { %1528 = vmatmul.mubr.msk.f32.vlgmr.msra.gmra.mrb[4].mxu1 %vm303_vm2, %v495_v14 }
 0x844   :  { %1677 = vmatpush3.bf16.msra.mxu1 %v1901_v24  ;;  %1549 = vmatprep.mubr.msk.f32.mxu1 %vm1779_vm1, %v1780_v20 }
 0x845   :  { %1678 = vmatprep.subr.bf16.mxu1 %v1778_v17 }
 0x848   :  { %1680 = vmatpush3.bf16.msra.mxu1 %v1916_v28 }
 0x849   :  { %1687 = vmatprep.subr.bf16.mxu1 %v1778_v17 }
 0x916   :  { %v564_v16 = vpop.f32.mrb[4].mxu1 }
 0x917   :  { %v568_v18 = vadd.f32 %v564_v16, %v178_v15  ;;  %v1529_v19 = vpop.f32.mrb[5].mxu1 }
 0x918   :  { %v277_v19 = vadd.f32 %v1376_v60, %v1928_v32  ;;  %v1186_v60 = vld [vmem:[%s2186_s11 + $0x10] sm:$0xff] }
 0x919   :  { %1753 = vtanh.f32 %v568_v18 }
 0x923   :  { %v1754_v21 = vpop.eup %1753 }
 0x924   :  { %574 = vrot.lane.b32.xlu0 %v1754_v21, %s1777_s2  ;;  %v570_v22 = vmul.f32 0.5, %v1754_v21 }
 0x926   :  { %v571_v23 = vadd.f32 0.5, %v570_v22 }
 0x928   :  { %v572_v27 = vmul.f32 %v571_v23, %v486_v10 }
 0x996   :  { %v575_v25 = vpop.permute.xlu0 %574 }
 0x997   :  { %v577_v26 = vmul.f32 %v575_v25, %v571_v23 }
 0x999   :  { %579 = vrot.lane.b32.xlu1 %v577_v26, %s1777_s2 }
 0xa0b   :  { %v580_v29 = vpop.permute.xlu1 %579 }
 0xa0c   :  { %v582_v30 = vadd.f32 %v580_v29, %v572_v27 }
 0xa0e   :  { %1755 = vtanh.f32 %v582_v30 }
 0xa18   :  { %v1756_v31 = vpop.eup %1755 }
 0xa19   :  { %585 = vrot.lane.b32.xlu0 %v1756_v31, %s1777_s2 }
 0xa8b   :  { %v586_v33 = vpop.permute.xlu0 %585 }
 0xa8c   :  { %v588_v34 = vmul.f32 %v586_v33, %v571_v23 }
 0xa8e   :  { %590 = vrot.lane.b32.xlu1 %v588_v34, %s1781_s4 }
 0xb00   :  { %v591_v35 = vpop.permute.xlu1 %590 }
 0xb01   :  { %1539 = vmatmul.mubr.msk.f32.vlgmr.msra.gmra.mrb[10].mxu0 %vm303_vm2, %v591_v35  ;;  %v198_v35 = vadd.f32 %v1969_v59, %v1880_v5  ;;  %v1002_v59 = vld [vmem:[%s2182_s7] sm:$0xff] }
 0xb02   :  { %1683 = vmatpush3.bf16.msra.mxu0 %v1901_v24  ;;  %1560 = vmatprep.mubr.msk.f32.mxu0 %vm1779_vm1, %v1780_v20 }
 0xb03   :  { %1684 = vmatprep.subr.bf16.mxu0 %v1778_v17 }
 0xb06   :  { %1686 = vmatpush3.bf16.msra.mxu0 %v1916_v28 }
 0xb07   :  { %1693 = vmatprep.subr.bf16.mxu0 %v1778_v17 }
 0xbd4   :  { %v660_v37 = vpop.f32.mrb[10].mxu0 }
 0xbd5   :  { %v664_v38 = vadd.f32 %v660_v37, %v183_v36  ;;  %v1540_v39 = vpop.f32.mrb[11].mxu0 }
 0xbd7   :  { %1757 = vtanh.f32 %v664_v38 }
 0xbe1   :  { %v1758_v40 = vpop.eup %1757 }
 0xbe2   :  { %670 = vrot.lane.b32.xlu0 %v1758_v40, %s1777_s2  ;;  %v666_v41 = vmul.f32 0.5, %v1758_v40 }
 0xbe4   :  { %v667_v42 = vadd.f32 0.5, %v666_v41 }
 0xbe6   :  { %v668_v45 = vmul.f32 %v667_v42, %v582_v30 }
 0xc54   :  { %v671_v43 = vpop.permute.xlu0 %670 }
 0xc55   :  { %v673_v44 = vmul.f32 %v671_v43, %v667_v42 }
 0xc57   :  { %675 = vrot.lane.b32.xlu1 %v673_v44, %s1777_s2 }
 0xcc9   :  { %v676_v46 = vpop.permute.xlu1 %675 }
 0xcca   :  { %v678_v47 = vadd.f32 %v676_v46, %v668_v45 }
 0xccc   :  { %1759 = vtanh.f32 %v678_v47 }
 0xcd6   :  { %v1760_v48 = vpop.eup %1759 }
 0xcd7   :  { %681 = vrot.lane.b32.xlu0 %v1760_v48, %s1777_s2  ;;  %v1003_v48 = vld [vmem:[%s2182_s7 + $0x8] sm:$0xff] }
 0xd49   :  { %v682_v49 = vpop.permute.xlu0 %681 }
 0xd4a   :  { %v684_v50 = vmul.f32 %v682_v49, %v667_v42  ;;  %v1004_v49 = vld [vmem:[%s2182_s7 + $0x10] sm:$0xff] }
 0xd4c   :  { %686 = vrot.lane.b32.xlu1 %v684_v50, %s1781_s4  ;;  %v1694_v50 = vpack.c.bf16 %v1003_v48, %v1002_v59 }
 0xdbe   :  { %v687_v51 = vpop.permute.xlu1 %686 }
 0xdbf   :  { %1550 = vmatmul.mubr.msk.f32.vlgmr.msra.gmra.mrb[6].mxu1 %vm303_vm2, %v687_v51  ;;  %v1005_v51 = vld [vmem:[%s2182_s7 + $0x18] sm:$0xff] }
 0xdc0   :  { %1689 = vmatpush3.bf16.msra.mxu1 %v1901_v24  ;;  %1571 = vmatprep.mubr.msk.f32.mxu1 %vm1779_vm1, %v1780_v20 }
 0xdc1   :  { %1690 = vmatprep.subr.bf16.mxu1 %v1778_v17 }
 0xdc4   :  { %1692 = vmatpush3.bf16.msra.mxu1 %v1916_v28 }
 0xdc5   :  { %1705 = vmatprep.subr.bf16.mxu1 %v1778_v17 }
 0xe92   :  { %v756_v53 = vpop.f32.mrb[6].mxu1 }
 0xe93   :  { %v760_v54 = vadd.f32 %v756_v53, %v188_v52  ;;  %v1551_v55 = vpop.f32.mrb[7].mxu1  ;;  %v1697_v52 = vpack.c.bf16 %v1005_v51, %v1004_v49  ;;  %v1006_v53 = vld [vmem:[%s2182_s7 + $0x20] sm:$0xff] }
 0xe94   :  { %v1391_v49 = vld [vmem:[%s2190_s14] ss:$0 sm:$0xff] }
 0xe95   :  { %1761 = vtanh.f32 %v760_v54  ;;  %v1007_v54 = vld [vmem:[%s2182_s7 + $0x28] sm:$0xff] }
 0xe96   :  { %v1700_v55 = vpack.c.bf16 %v1007_v54, %v1006_v53 }
 0xe9f   :  { %v1762_v56 = vpop.eup %1761 }
 0xea0   :  { %766 = vrot.lane.b32.xlu0 %v1762_v56, %s1777_s2  ;;  %v762_v24 = vmul.f32 0.5, %v1762_v56  ;;  %v1008_v56 = vld [vmem:[%s2182_s7 + $0x30] sm:$0xff] }
 0xea2   :  { %v763_v58 = vadd.f32 0.5, %v762_v24  ;;  %v1009_v24 = vld [vmem:[%s2182_s7 + $0x38] sm:$0xff] }
 0xea4   :  { %v764_v63 = vmul.f32 %v763_v58, %v678_v47 }
 0xf12   :  { %v767_v61 = vpop.permute.xlu0 %766 }
 0xf13   :  { %v769_v62 = vmul.f32 %v767_v61, %v763_v58  ;;  %v1703_v61 = vpack.c.bf16 %v1009_v24, %v1008_v56 }
 0xf15   :  { %771 = vrot.lane.b32.xlu1 %v769_v62, %s1777_s2  ;;  %v1097_v62 = vld [vmem:[%s2183_s9] sm:$0xff] }
 0xf87   :  { %v772_v28 = vpop.permute.xlu1 %771 }
 0xf88   :  { %v774_v0 = vadd.f32 %v772_v28, %v764_v63  ;;  %v1098_v63 = vld [vmem:[%s2183_s9 + $0x8] sm:$0xff] }
 0xf89   :  { %v1706_v28 = vpack.c.bf16 %v1098_v63, %v1097_v62 }
 0xf8a   :  { %1763 = vtanh.f32 %v774_v0 }
 0xf94   :  { %v1764_v1 = vpop.eup %1763 }
 0xf95   :  { %777 = vrot.lane.b32.xlu0 %v1764_v1, %s1777_s2  ;;  %v1100_v1 = vld [vmem:[%s2183_s9 + $0x18] sm:$0xff] }
0x1007   :  { %v778_v57 = vpop.permute.xlu0 %777 }
0x1008   :  { %v780_v2 = vmul.f32 %v778_v57, %v763_v58 }
0x100a   :  { %782 = vrot.lane.b32.xlu1 %v780_v2, %s1781_s4 }
0x107c   :  { %v783_v3 = vpop.permute.xlu1 %782 }
0x107d   :  { %1561 = vmatmul.mubr.msk.f32.vlgmr.msra.gmra.mrb[12].mxu0 %vm303_vm2, %v783_v3 }
0x107e   :  { %1590 = vmatprep.mubr.msk.f32.mxu0 %vm1779_vm1, %v1780_v20  ;;  %1695 = vmatpush3.bf16.msra.mxu0 %v1694_v50 }
0x107f   :  { %1696 = vmatprep.subr.bf16.mxu0 %v1778_v17 }
0x1082   :  { %1698 = vmatpush3.bf16.msra.mxu0 %v1697_v52 }
0x1083   :  { %1699 = vmatprep.subr.bf16.mxu0 %v1778_v17 }
0x1086   :  { %1701 = vmatpush3.bf16.msra.mxu0 %v1700_v55 }
0x1087   :  { %1702 = vmatprep.subr.bf16.mxu0 %v1778_v17 }
0x108a   :  { %1704 = vmatpush3.bf16.msra.mxu0 %v1703_v61 }
0x108b   :  { %1723 = vmatprep.subr.bf16.mxu0 %v1778_v17 }
0x1150   :  { %v852_v6 = vpop.f32.mrb[12].mxu0 }
0x1151   :  { %v856_v7 = vadd.f32 %v852_v6, %v193_v4  ;;  %v1562_v8 = vpop.f32.mrb[13].mxu0  ;;  %v1091_v4 = vld [vmem:[%s2184_s1] sm:$0xff] }
0x1153   :  { %1765 = vtanh.f32 %v856_v7 }
0x115d   :  { %v1766_v9 = vpop.eup %1765 }
0x115e   :  { %862 = vrot.lane.b32.xlu0 %v1766_v9, %s1777_s2  ;;  %v858_v10 = vmul.f32 0.5, %v1766_v9  ;;  %v1101_v9 = vld [vmem:[%s2183_s9 + $0x20] sm:$0xff] }
0x1160   :  { %v859_v11 = vadd.f32 0.5, %v858_v10  ;;  %v1385_v10 = vld [vmem:[%s2185_s8] ss:$0 sm:$0xff] }
0x1162   :  { %v860_v14 = vmul.f32 %v859_v11, %v774_v0  ;;  %v1099_v0 = vld [vmem:[%s2183_s9 + $0x10] sm:$0xff] }
0x1163   :  { %v1709_v57 = vpack.c.bf16 %v1100_v1, %v1099_v0 }
0x11d0   :  { %v863_v12 = vpop.permute.xlu0 %862 }
0x11d1   :  { %v865_v13 = vmul.f32 %v863_v12, %v859_v11  ;;  %v1185_v12 = vld [vmem:[%s2186_s11 + $0x8] sm:$0xff] }
0x11d3   :  { %867 = vrot.lane.b32.xlu1 %v865_v13, %s1777_s2 }
0x1245   :  { %v868_v15 = vpop.permute.xlu1 %867 }
0x1246   :  { %v870_v16 = vadd.f32 %v868_v15, %v860_v14 }
0x1248   :  { %1767 = vtanh.f32 %v870_v16 }
0x1249   :  { %1769 = vtanh.f32 %v277_v19  ;;  %v1187_v19 = vld [vmem:[%s2186_s11 + $0x18] sm:$0xff] }
0x1252   :  { %v1768_v18 = vpop.eup %1767 }
0x1253   :  { %873 = vrot.lane.b32.xlu0 %v1768_v18, %s1777_s2  ;;  %v1770_v23 = vpop.eup %1769 }
0x1254   :  { %v974_v25 = vmul.f32 0.5, %v1770_v23 }
0x1256   :  { %v975_v27 = vadd.f32 0.5, %v974_v25  ;;  %v1189_v25 = vld [vmem:[%s2186_s11 + $0x28] sm:$0xff] }
0x1258   :  { %v976_v32 = vmul.f32 0.0, %v975_v27 }
0x12c5   :  { %v874_v21 = vpop.permute.xlu0 %873 }
0x12c6   :  { %v876_v22 = vmul.f32 %v874_v21, %v859_v11  ;;  %v1184_v11 = vld [vmem:[%s2186_s11] sm:$0xff] }
0x12c7   :  { %v1712_v18 = vpack.c.bf16 %v1185_v12, %v1184_v11 }
0x12c8   :  { %878 = vrot.lane.b32.xlu1 %v876_v22, %s1781_s4  ;;  %v1715_v22 = vpack.c.bf16 %v1187_v19, %v1186_v60 }
0x12cc   :  { %978 = vrot.lane.b32.xlu1 %v1770_v23, %s1777_s2  ;;  %v1188_v23 = vld [vmem:[%s2186_s11 + $0x20] sm:$0xff] }
0x133a   :  { %v879_v26 = vpop.permute.xlu1 %878 }
0x133b   :  { %1572 = vmatmul.mubr.msk.f32.vlgmr.msra.gmra.mrb[8].mxu1 %vm303_vm2, %v879_v26  ;;  %v1718_v26 = vpack.c.bf16 %v1189_v25, %v1188_v23 }
0x133c   :  { %1603 = vmatprep.mubr.msk.f32.mxu1 %vm1779_vm1, %v1780_v20  ;;  %1707 = vmatpush3.bf16.msra.mxu1 %v1706_v28 }
0x133d   :  { %1708 = vmatprep.subr.bf16.mxu1 %v1778_v17 }
0x133e   :  { %v979_v29 = vpop.permute.xlu1 %978 }
0x133f   :  { %v981_v30 = vmul.f32 %v979_v29, %v975_v27 }
0x1340   :  { %1710 = vmatpush3.bf16.msra.mxu1 %v1709_v57 }
0x1341   :  { %983 = vrot.lane.b32.xlu1 %v981_v30, %s1777_s2  ;;  %1601 = vmatprep.subr.mxu1 %v1780_v20  ;;  %v1273_v30 = vld [vmem:[%s2187_s13] sm:$0xff] }
0x1344   :  { %1602 = vmatpush3.msra.mxu1 %v1101_v9 }
0x1345   :  { %1711 = vmatprep.subr.bf16.mxu1 %v1778_v17 }
0x13b3   :  { %v984_v31 = vpop.permute.xlu1 %983 }
0x13b4   :  { %v986_v33 = vadd.f32 %v984_v31, %v976_v32  ;;  %v1274_v32 = vld [vmem:[%s2187_s13 + $0x8] sm:$0xff]  ;;  %v1275_v31 = vld [vmem:[%s2187_s13 + $0x10] sm:$0xff] }
0x13b6   :  { %1771 = vtanh.f32 %v986_v33  ;;  %v1724_v33 = vpack.c.bf16 %v1274_v32, %v1273_v30 }
0x13c0   :  { %v1772_v34 = vpop.eup %1771 }
0x13c1   :  { %989 = vrot.lane.b32.xlu1 %v1772_v34, %s1777_s2  ;;  %v1276_v34 = vld [vmem:[%s2187_s13 + $0x18] sm:$0xff] }
0x140e   :  { %v948_v36 = vpop.f32.mrb[8].mxu1 }
0x140f   :  { %v952_v37 = vadd.f32 %v948_v36, %v198_v35  ;;  %v1573_v38 = vpop.f32.mrb[9].mxu1  ;;  %v1727_v35 = vpack.c.bf16 %v1276_v34, %v1275_v31  ;;  %v1277_v36 = vld [vmem:[%s2187_s13 + $0x20] sm:$0xff] }
0x1411   :  { %1773 = vtanh.f32 %v952_v37  ;;  %v1278_v37 = vld [vmem:[%s2187_s13 + $0x28] sm:$0xff] }
0x1412   :  { %v1730_v38 = vpack.c.bf16 %v1278_v37, %v1277_v36 }
0x141b   :  { %v1774_v39 = vpop.eup %1773 }
0x141c   :  { %958 = vrot.lane.b32.xlu0 %v1774_v39, %s1777_s2  ;;  %v954_v42 = vmul.f32 0.5, %v1774_v39  ;;  %v1387_v39 = vld [vmem:[%s2188_s10] ss:$0 sm:$0xff] }
0x141e   :  { %v955_v43 = vadd.f32 0.5, %v954_v42 }
0x1420   :  { %v956_v46 = vmul.f32 %v955_v43, %v870_v16 }
0x1433   :  { %v990_v40 = vpop.permute.xlu1 %989 }
0x1434   :  { %v992_v41 = vmul.f32 %v990_v40, %v975_v27  ;;  %v1191_v27 = vld [vmem:[%s2186_s11 + $0x38] sm:$0xff] }
0x1436   :  { %998 = vrot.lane.b32.xlu1 %v992_v41, %s1782_s6 }
0x148e   :  { %v959_v44 = vpop.permute.xlu0 %958 }
0x148f   :  { %v961_v45 = vmul.f32 %v959_v44, %v955_v43  ;;  %v1279_v44 = vld [vmem:[%s2187_s13 + $0x30] sm:$0xff] }
0x1491   :  { %963 = vrot.lane.b32.xlu0 %v961_v45, %s1777_s2  ;;  %v1280_v45 = vld [vmem:[%s2187_s13 + $0x38] sm:$0xff] }
0x14a8   :  { %v999_v6 = vpop.permute.xlu1 %998 }
0x1503   :  { %v964_v47 = vpop.permute.xlu0 %963 }
0x1504   :  { %v966_v5 = vadd.f32 %v964_v47, %v956_v46  ;;  %v1733_v46 = vpack.c.bf16 %v1280_v45, %v1279_v44 }
0x1506   :  { %1775 = vtanh.f32 %v966_v5 }
0x1510   :  { %v1776_v58 = vpop.eup %1775 }
0x1511   :  { %969 = vrot.lane.b32.xlu0 %v1776_v58, %s1777_s2 }
0x1583   :  { %v970_v2 = vpop.permute.xlu0 %969 }
0x1584   :  { %v972_v3 = vmul.f32 %v970_v2, %v955_v43 }
0x1586   :  { %994 = vrot.lane.b32.xlu0 %v972_v3, %s1781_s4 }
0x158a   :  { %1093 = vrot.lane.b32.xlu0 %v1091_v4, %s1777_s2 }
0x15f8   :  { %v995_v7 = vpop.permute.xlu0 %994 }
0x15f9   :  { %v1001_v8 = vsel %vm303_vm2, %v995_v7, %v999_v6 }
0x15fa   :  { %1591 = vmatmul.mubr.msk.f32.vlgmr.msra.gmra.mrb[14].mxu0 %vm1017_vm3, %v1001_v8 }
0x15fb   :  { %1641 = vmatprep.mubr.msk.f32.mxu0 %vm1779_vm1, %v1780_v20  ;;  %1725 = vmatpush3.bf16.msra.mxu0 %v1724_v33 }
0x15fc   :  { %v1094_v14 = vpop.permute.xlu0 %1093  ;;  %1726 = vmatprep.subr.bf16.mxu0 %v1778_v17 }
0x15ff   :  { %1728 = vmatpush3.bf16.msra.mxu0 %v1727_v35 }
0x1600   :  { %1729 = vmatprep.subr.bf16.mxu0 %v1778_v17 }
0x1603   :  { %1731 = vmatpush3.bf16.msra.mxu0 %v1730_v38 }
0x1604   :  { %1732 = vmatprep.subr.bf16.mxu0 %v1778_v17 }
0x1607   :  { %1734 = vmatpush3.bf16.msra.mxu0 %v1733_v46 }
0x16cd   :  { %v1087_v13 = vpop.f32.mrb[14].mxu0 }
0x16ce   :  { %v1088_v15 = vadd.f32 %v1385_v10, %v1087_v13  ;;  %v1592_v16 = vpop.f32.mrb[15].mxu0 }
0x16d0   :  { %v1096_v21 = vsel %vm303_vm2, %v1088_v15, %v1094_v14 }
0x16d1   :  { %1604 = vmatmul.mubr.msk.f32.vlgmr.msra.gmra.mrb[10].mxu1 %vm1109_vm4, %v1096_v21 }
0x16d2   :  { %1713 = vmatpush3.bf16.msra.mxu1 %v1712_v18  ;;  %1622 = vmatprep.mubr.msk.f32.mxu1 %vm1779_vm1, %v1780_v20  ;;  %v1190_v20 = vld [vmem:[%s2186_s11 + $0x30] sm:$0xff] }
0x16d3   :  { %1714 = vmatprep.subr.bf16.mxu1 %v1778_v17  ;;  %v1721_v29 = vpack.c.bf16 %v1191_v27, %v1190_v20 }
0x16d6   :  { %1716 = vmatpush3.bf16.msra.mxu1 %v1715_v22 }
0x16d7   :  { %1717 = vmatprep.subr.bf16.mxu1 %v1778_v17 }
0x16da   :  { %1719 = vmatpush3.bf16.msra.mxu1 %v1718_v26 }
0x16db   :  { %1720 = vmatprep.subr.bf16.mxu1 %v1778_v17  ;;  %v1389_v17 = vld [vmem:[%s2189_s12] ss:$0 sm:$0xff] }
0x16de   :  { %1722 = vmatpush3.bf16.msra.mxu1 %v1721_v29 }
0x17a4   :  { %v1179_v40 = vpop.f32.mrb[10].mxu1 }
0x17a5   :  { %v1180_v41 = vadd.f32 %v1387_v39, %v1179_v40  ;;  %v1605_v42 = vpop.f32.mrb[11].mxu1 }
0x17a7   :  { %v1183_v43 = vmax.f32 %v1180_v41, 0.0 }
0x17a9   :  { %1623 = vmatmul.mubr.msk.f32.vlgmr.msra.gmra.mrb[12].mxu1 %vm1017_vm3, %v1183_v43 }
0x187c   :  { %v1268_v47 = vpop.f32.mrb[12].mxu1 }
0x187d   :  { %v1269_v5 = vadd.f32 %v1389_v17, %v1268_v47  ;;  %v1624_v59 = vpop.f32.mrb[13].mxu1 }
0x187f   :  { %v1272_v48 = vmax.f32 %v1269_v5, 0.0 }
0x1881   :  { %1642 = vmatmul.mubr.msk.f32.vlgmr.msra.gmra.mrb[16].mxu0 %vm1017_vm3, %v1272_v48 }
0x1954   :  { %v1357_v50 = vpop.f32.mrb[16].mxu0 }
0x1955   :  { %v1358_v51 = vadd.f32 %v1391_v49, %v1357_v50  ;;  %v1643_v52 = vpop.f32.mrb[17].mxu0 }
0x1957   :  { %1362 = vst.msk [vmem:[%s2191_s15] sm:$0xff] %vm1361_vm5, %v1358_v51 }

</bundles_post_ra>
